<compile_context>
chip_gen: v7x
topology: tpu7x:2x2x1
jax: 0.10.0
libtpu: 0.0.40
codegen_flags: <defaults>
</compile_context>

<pallas_src>
import jax
import jax.numpy as jnp
from jax.experimental import pallas as pl
from jax.experimental.pallas import tpu as pltpu


def interp_kernel(spans_ref, h_ref, out_ref):
    """spans_ref: (TB, S, H) VMEM; h_ref: (1, H) VMEM; out_ref: (TB, H) VMEM."""
    spans = spans_ref[...].astype(jnp.float32)            # (TB, S, H)
    H = spans.shape[-1]
    h = h_ref[...].astype(jnp.float32).reshape(1, 1, H)   # broadcast query vec

    # alpha scores for every row of the batch block: (TB, S).
    # VPU multiply + lane reduce; compute is fully hidden under the spans DMA,
    # so an MXU formulation buys nothing at these sizes.
    scores = jnp.sum(spans * h, axis=-1)                   # (TB, S)

    # Numerically stable softmax over the span axis (PyTorch dim=1), kept
    # unnormalized; 1/denom is folded in once on the final (TB, H) result.
    m = jnp.max(scores, axis=-1, keepdims=True)            # (TB, 1)
    e = jnp.exp(scores - m)                                # (TB, S)  EUP
    denom = jnp.sum(e, axis=-1, keepdims=True)             # (TB, 1)

    h_unnorm = jnp.sum(e[..., None] * spans, axis=1)       # (TB, H)  sublane reduce
    inv = pl.reciprocal(denom, approx=False)               # EUP; exact (keeps 1e-5 match)
    out_ref[...] = (h_unnorm * inv).astype(out_ref.dtype)


def _pick_batch_block(B, row_bytes, target_bytes=2 << 20):
    """Rows per grid step: ~target_bytes of spans, 8-row aligned, and at least
    2 grid steps when possible so both v7x TensorCores get work."""
    tb = max(1, min(B, target_bytes // row_bytes))
    if B > 8:
        half = max(8, (((B + 1) // 2) // 8) * 8)   # ~ceil(B/2), rounded down to 8
        tb = min(tb, half)
        tb = max(8, (tb // 8) * 8)
    return tb


def interpretation_layer(spans, h_hat, *, target_block_bytes=2 << 20):
    """spans: (B, S, H), h_hat: (H,) -> (B, H)."""
    B, S, H = spans.shape
    row_bytes = S * H * spans.dtype.itemsize
    tb = _pick_batch_block(B, row_bytes, target_block_bytes)
    grid = (pl.cdiv(B, tb),)

    h_hat2d = h_hat.reshape(1, H)

    return pl.pallas_call(
        interp_kernel,
        out_shape=jax.ShapeDtypeStruct((B, H), spans.dtype),
        grid_spec=pltpu.PrefetchScalarGridSpec(
            num_scalar_prefetch=0,
            grid=grid,
            in_specs=[
                pl.BlockSpec((tb, S, H), lambda b: (b, 0, 0)),   # spans batch block
                pl.BlockSpec((1, H), lambda b: (0, 0)),          # shared h_hat
            ],
            out_specs=pl.BlockSpec((tb, H), lambda b: (b, 0)),   # contiguous slab
        ),
        compiler_params=pltpu.CompilerParams(
            dimension_semantics=("parallel",)),
    )(spans, h_hat2d)


def interpretation_layer_ref(spans, h_hat):
    scores = jnp.sum(spans * h_hat[None, None, :], axis=-1)   # exact f32 reference
    alpha = jax.nn.softmax(scores, axis=1)
    return jnp.sum(alpha[..., None] * spans, axis=1)


if __name__ == "__main__":
    key = jax.random.PRNGKey(0)
    k_spans, k_h, k_spans2 = jax.random.split(key, 3)

    S, H = 8, 32

    # Small case matching the module's natural shapes.
    B = 2
    spans = jax.random.normal(k_spans, (B, S, H), dtype=jnp.float32)
    h_hat = jax.random.normal(k_h, (H,), dtype=jnp.float32)
    out = jax.block_until_ready(interpretation_layer(spans, h_hat))
    ref = interpretation_layer_ref(spans, h_hat)
    assert out.shape == (B, H)
    assert jnp.allclose(out, ref, atol=1e-5, rtol=1e-5)

    # Blocked case: >= 2 grid steps and a masked (padded) tail block.
    B2 = 600
    spans2 = jax.random.normal(k_spans2, (B2, S, H), dtype=jnp.float32)
    out2 = jax.block_until_ready(interpretation_layer(spans2, h_hat))
    ref2 = interpretation_layer_ref(spans2, h_hat)
    assert out2.shape == (B2, H)
    assert jnp.allclose(out2, ref2, atol=1e-5, rtol=1e-5)

    print("KERNEL_OK")
</pallas_src>

<mosaic_0001>
module attributes {stable_mosaic.version = 11 : i64} {
  func.func @interp_kernel(%arg0: i32, %arg1: memref<2x8x32xf32, #tpu.memory_space<vmem>>, %arg2: memref<1x32xf32, #tpu.memory_space<vmem>>, %arg3: memref<2x32xf32, #tpu.memory_space<vmem>>) attributes {dimension_semantics = [#tpu.dimension_semantics<parallel>], iteration_bounds = array<i64: 1>, scalar_prefetch = 0 : i64, scratch_operands = 0 : i64, tpu.core_type = #tpu.core_type<tc>, window_params = [{transform_indices = @transform_0, window_bounds = array<i64: 2, 8, 32>}, {pipeline_mode = #tpu.pipeline_mode<synchronous>, transform_indices = @transform_1, window_bounds = array<i64: 1, 32>}, {transform_indices = @transform_2, window_bounds = array<i64: 2, 32>}]} {
    %c0 = arith.constant 0 : index
    %c0_0 = arith.constant 0 : index
    %c0_1 = arith.constant 0 : index
    %0 = vector.load %arg1[%c0, %c0_0, %c0_1] : memref<2x8x32xf32, #tpu.memory_space<vmem>>, vector<2x8x32xf32>
    %c0_2 = arith.constant 0 : index
    %c0_3 = arith.constant 0 : index
    %1 = vector.load %arg2[%c0_2, %c0_3] : memref<1x32xf32, #tpu.memory_space<vmem>>, vector<1x32xf32>
    %2 = vector.shape_cast %1 : vector<1x32xf32> to vector<1x1x32xf32>
    %3 = vector.broadcast %2 : vector<1x1x32xf32> to vector<2x8x32xf32>
    %4 = arith.mulf %0, %3 : vector<2x8x32xf32>
    %cst = arith.constant dense<0.000000e+00> : vector<2x8xf32>
    %5 = vector.multi_reduction <add>, %4, %cst [2] : vector<2x8x32xf32> to vector<2x8xf32>
    %cst_4 = arith.constant dense<0xFF800000> : vector<2xf32>
    %6 = vector.multi_reduction <maximumf>, %5, %cst_4 [1] : vector<2x8xf32> to vector<2xf32>
    %7 = vector.shape_cast %6 : vector<2xf32> to vector<2x1xf32>
    %8 = vector.broadcast %7 : vector<2x1xf32> to vector<2x8xf32>
    %9 = arith.subf %5, %8 : vector<2x8xf32>
    %10 = math.exp %9 : vector<2x8xf32>
    %cst_5 = arith.constant dense<0.000000e+00> : vector<2xf32>
    %11 = vector.multi_reduction <add>, %10, %cst_5 [1] : vector<2x8xf32> to vector<2xf32>
    %12 = vector.shape_cast %11 : vector<2xf32> to vector<2x1xf32>
    %13 = vector.shape_cast %10 : vector<2x8xf32> to vector<2x8x1xf32>
    %14 = vector.broadcast %13 : vector<2x8x1xf32> to vector<2x8x32xf32>
    %15 = arith.mulf %14, %0 : vector<2x8x32xf32>
    %cst_6 = arith.constant dense<0.000000e+00> : vector<2x32xf32>
    %16 = vector.multi_reduction <add>, %15, %cst_6 [1] : vector<2x8x32xf32> to vector<2x32xf32>
    %17 = tpu.reciprocal %12 : vector<2x1xf32> -> vector<2x1xf32>
    %18 = vector.broadcast %17 : vector<2x1xf32> to vector<2x32xf32>
    %19 = arith.mulf %16, %18 : vector<2x32xf32>
    %c0_7 = arith.constant 0 : index
    %c0_8 = arith.constant 0 : index
    %20 = vector.load %arg3[%c0_7, %c0_8] : memref<2x32xf32, #tpu.memory_space<vmem>>, vector<2x32xf32>
    tpu.vector_store %arg3[%c0_7, %c0_8], %19 {strides = array<i32>} : memref<2x32xf32, #tpu.memory_space<vmem>>, vector<2x32xf32>,
    return
  }
  func.func @transform_0(%arg0: i32) -> (i32, i32, i32) {
    %c0_i32 = arith.constant 0 : i32
    %c0_i32_0 = arith.constant 0 : i32
    %c0_i32_1 = arith.constant 0 : i32
    return %arg0, %c0_i32, %c0_i32_0 : i32, i32, i32
  }
  func.func @transform_1(%arg0: i32) -> (i32, i32) {
    %c0_i32 = arith.constant 0 : i32
    %c0_i32_0 = arith.constant 0 : i32
    %c0_i32_1 = arith.constant 0 : i32
    return %c0_i32, %c0_i32_0 : i32, i32
  }
  func.func @transform_2(%arg0: i32) -> (i32, i32) {
    %c0_i32 = arith.constant 0 : i32
    %c0_i32_0 = arith.constant 0 : i32
    return %arg0, %c0_i32 : i32, i32
  }
}

</mosaic_0001>

<bundles_post_ra>
// kernel: tpu_custom_call.1
= control target key start
LH: loop header
LB: loop body
LE: loop exit
PB: predicated region body
PF: predicated region fallthrough
CT: control target
= control target key end

     0   :  { %7 = vsyncpa [#allocation3], 0  ;;  %s266_s0 = inlined_call_operand.hbm [shape: f32[2,8,32], index: 0, kind: input, shape index: {}]   ;;  %s267_s1 = inlined_call_operand.vmem [shape: f32[1,32], index: 1, kind: input, shape index: {}]   ;;  %s268_s2 = inlined_call_operand.hbm [shape: f32[2,32], index: 2, kind: output, shape index: {}]  }
   0x1   :  { %8 = vsyncpa [#allocation4], 0  ;;  %s210_s9 = smov [#allocation2]   ;;  %s162_s13 = scalar_lea.hbm %s266_s0, 256 }
   0x2   :  { %s14_s10 = sshll.u32 %s210_s9, 4  ;;  %p163_p0 = scmp.ne.s32.totalorder %s266_s0, %s162_s13  ;;  %s15_s10 = int_to_ptr.vmem [resolvable:$true] %s14_s10 }
   0x3   :  { %p166_p1 = scmp.lt.u32.totalorder %s162_s13, %s266_s0 }
   0x5   :  { %p168_p2 = pnand %p166_p1, %p163_p0 }
   0x7   :  { %171 = shalt.err (!%p168_p2)
}
   0x8   :  { %s172_s18 = scalar_lea.vmem %s15_s10, 256  ;;  %p177_p4 = scmp.lt.s32.totalorder %s15_s10, %s15_s10 }
   0x9   :  { %p173_p3 = scmp.ne.s32.totalorder %s15_s10, %s172_s18  ;;  %p178_p5 = scmp.lt.s32.totalorder %s172_s18, %s172_s18 }
   0xb   :  { %p179_p6 = por %p178_p5, %p177_p4 }
   0xd   :  { %p180_p7 = pnand %p179_p6, %p173_p3 }
   0xf   :  { %183 = shalt.err (!%p180_p7)
}
  0x10   :  { %s211_s19 = smov 128   ;;  %s212_s20 = smov 8  }
  0x11   :  { %20 = dma.hbm_to_vmem [thread:$0]  %s266_s0, 256, %s15_s10, [#allocation3], %s211_s19, %s211_s19, %s212_s20  }
  0x12   :  { %206 = dma.done.wait [#allocation3], 256  }
  0x13   :  { %207 = vsyncadd [#allocation3], 4294967040  ;;  %v26_v0 = vld [vmem:[#allocation2] sm:$0xff]  ;;  %vm37_vm0 = vcmask 261120   ;;  %v27_v2 = vld [vmem:[#allocation2 + $0x8] sm:$0xff]  ;;  %v46_v7 = vlaneseq  ;;  %vm56_vm1 = vcmask 1041409  }
  0x14   :  { %v148_v1 = vld [vmem:[%s267_s1] ss:$0 sm:$0xff]  ;;  %vm59_vm2 = vcmask 58368   ;;  %v213_v17 = vmov 0   ;;  %s214_s0 = smov [#allocation5]   ;;  %vm131_vm3 = vcmask 254976  }
  0x15   :  { %v35_v3 = vmul.f32 %v148_v1, %v26_v0  ;;  %v36_v4 = vmul.f32 %v148_v1, %v27_v2  ;;  %v47_v8 = vand.u32 127, %v46_v7  ;;  %v49_v9 = vshrl.u32 %v46_v7, 7  ;;  %155 = vset.pattern.permute.xlu0 %v213_v17  ;;  %154 = vset.pattern.permute.xlu1 %v213_v17  ;;  %s139_s1 = sshll.u32 %s214_s0, 4  ;;  %s140_s1 = int_to_ptr.vmem [resolvable:$true] %s139_s1 }
  0x16   :  { %s184_s25 = scalar_lea.vmem %s140_s1, 32  ;;  %p189_p9 = scmp.lt.s32.totalorder %s140_s1, %s140_s1 }
  0x17   :  { %v38_v5 = vsel %vm37_vm0, %v35_v3, 0.0  ;;  %v41_v6 = vsel %vm37_vm0, %v36_v4, 0.0  ;;  %v50_v11 = vsub.s32 %v47_v8, %v49_v9  ;;  %v66_v18 = vsub.s32 0, %v49_v9  ;;  %p185_p8 = scmp.ne.s32.totalorder %s140_s1, %s184_s25  ;;  %p190_p10 = scmp.lt.s32.totalorder %s184_s25, %s184_s25 }
  0x18   :  { %39 = vadd.xlane.f32.xlu0 %v38_v5  ;;  %v70_v19 = vsub.s32 1, %v49_v9 }
  0x19   :  { %p191_p11 = por %p190_p10, %p189_p9 }
  0x1b   :  { %p192_p12 = pnand %p191_p11, %p185_p8 }
  0x1c   :  { %42 = vadd.xlane.f32.xlu0 %v41_v6 }
  0xa5   :  { %v40_v10 = vpop.xlane.xlu0 %39 }
  0xa6   :  { %v51_v13 = vrot.slane %v40_v10, %v50_v11 }
  0xa9   :  { %v43_v12 = vpop.xlane.xlu0 %42 }
  0xaa   :  { %v55_v14 = vrot.slane %v43_v12, %v50_v11 }
  0xac   :  { %v57_v15 = vsel %vm56_vm1, %v55_v14, %v51_v13 }
  0xad   :  { %v60_v16 = vsel %vm59_vm2, %v57_v15, -inf }
  0xae   :  { %61 = vmax.xlane.f32.xlu1 %v60_v16 }
 0x13b   :  { %v62_v20 = vpop.xlane.xlu1 %61 }
 0x13c   :  { %v67_v21 = vrot.slane %v62_v20, %v66_v18  ;;  %v71_v22 = vrot.slane %v62_v20, %v70_v19 }
 0x13e   :  { %v74_v23 = vsub.f32 %v40_v10, %v67_v21  ;;  %v75_v24 = vsub.f32 %v43_v12, %v71_v22 }
 0x140   :  { %v76_v25 = vmul.f32 1.442695, %v74_v23  ;;  %v78_v26 = vmul.f32 1.442695, %v75_v24 }
 0x142   :  { %156 = vpow2.f32 %v76_v25 }
 0x143   :  { %158 = vpow2.f32 %v78_v26 }
 0x14c   :  { %v157_v27 = vpop.eup %156 }
 0x14d   :  { %v159_v28 = vpop.eup %158  ;;  %83 = vperm.xlu1 %154, %v157_v27  }
 0x14e   :  { %86 = vperm.xlu0 %155, %v159_v28  }
 0x1cc   :  { %v84_v29 = vpop.permute.xlu1 %83 }
 0x1cd   :  { %v87_v30 = vpop.permute.xlu0 %86  ;;  %v91_v31 = vrot.slane %v84_v29, %v50_v11  ;;  %v103_v36 = vmul.f32 %v84_v29, %v26_v0 }
 0x1ce   :  { %v95_v32 = vrot.slane %v87_v30, %v50_v11  ;;  %v104_v35 = vmul.f32 %v87_v30, %v27_v2 }
 0x1cf   :  { %v105_v38 = vsel %vm37_vm0, %v103_v36, 0.0 }
 0x1d0   :  { %v96_v33 = vsel %vm56_vm1, %v95_v32, %v91_v31  ;;  %v112_v37 = vsel %vm37_vm0, %v104_v35, 0.0  ;;  %v106_v40 = vrot.slane %v105_v38, 4 }
 0x1d1   :  { %v98_v34 = vsel %vm59_vm2, %v96_v33, 0.0  ;;  %v113_v39 = vrot.slane %v112_v37, 4 }
 0x1d2   :  { %99 = vadd.xlane.f32.xlu1 %v98_v34  ;;  %v107_v42 = vadd.f32 %v106_v40, %v105_v38 }
 0x1d3   :  { %v114_v41 = vadd.f32 %v113_v39, %v112_v37 }
 0x1d4   :  { %v108_v45 = vrot.slane %v107_v42, 2 }
 0x1d5   :  { %v115_v43 = vrot.slane %v114_v41, 2 }
 0x1d6   :  { %v109_v47 = vadd.f32 %v108_v45, %v107_v42 }
 0x1d7   :  { %v116_v46 = vadd.f32 %v115_v43, %v114_v41 }
 0x1d8   :  { %v110_v49 = vrot.slane %v109_v47, 1 }
 0x1d9   :  { %v117_v48 = vrot.slane %v116_v46, 1 }
 0x1da   :  { %v111_v53 = vadd.f32 %v110_v49, %v109_v47 }
 0x1db   :  { %v118_v51 = vadd.f32 %v117_v48, %v116_v46 }
 0x25f   :  { %v100_v44 = vpop.xlane.xlu1 %99 }
 0x260   :  { %160 = vrcp.f32 %v100_v44 }
 0x26a   :  { %v161_v50 = vpop.eup %160 }
 0x26b   :  { %v121_v52 = vrot.slane %v161_v50, 1  ;;  %v124_v55 = vmul.f32 %v161_v50, %v111_v53 }
 0x26d   :  { %v125_v54 = vmul.f32 %v121_v52, %v118_v51 }
 0x26f   :  { %v128_v56 = vrot.slane %v125_v54, 7 }
 0x271   :  { %v129_v57 = vsel %vm56_vm1, %v128_v56, %v124_v55 }
 0x272   :  { %132 = vst.msk [vmem:[#allocation5] sm:$0x3] %vm131_vm3, %v129_v57 }
 0x273   :  { %195 = shalt.err (!%p192_p12)
}
 0x274   :  { %s196_s28 = scalar_lea.hbm %s268_s2, 32 }
 0x275   :  { %p197_p13 = scmp.ne.s32.totalorder %s268_s2, %s196_s28  ;;  %p200_p0 = scmp.lt.u32.totalorder %s196_s28, %s268_s2 }
 0x277   :  { %p202_p1 = pnand %p200_p0, %p197_p13 }
 0x279   :  { %205 = shalt.err (!%p202_p1)
}
 0x27a   :  { %142 = dma.vmem_to_hbm [thread:$0]  %s140_s1, 32, %s268_s2, [#allocation4]  }
 0x27b   :  { %208 = dma.done.wait [#allocation4], 32  }
 0x27c   :  { %209 = vsyncadd [#allocation4], 4294967264 }
 0x27d   :  { %146 = vsyncpa [#allocation3], 1 }
 0x27e   :  { %147 = vsyncpa [#allocation4], 1 }

</bundles_post_ra>
